<compile_context>
chip_gen: v7x
topology: tpu7x:2x2x1
jax: 0.10.0
libtpu: 0.0.40
codegen_flags: <defaults>
</compile_context>

<pallas_src>
import functools
import math

import jax
import jax.numpy as jnp
from jax.experimental import pallas as pl
from jax.experimental.pallas import tpu as pltpu


def _round_up(x, m):
    return ((x + m - 1) // m) * m


def _pick_tn(in_features, out_features, budget_bytes=16 * 2**20):
    """Per-gate hidden-tile width (multiple of 128 lanes).

    Chooses the largest tn that divides the padded hidden size while keeping
    the (double-buffered) per-grid-step weight blocks within `budget_bytes`,
    so very large hidden sizes stream through VMEM instead of needing a
    monolithic resident weight block."""
    in_p = _round_up(in_features, 128)
    out_p = _round_up(out_features, 128)

    def per_step_weight_bytes(t):
        return 2 * (in_p + out_p) * 4 * t * 2  # 2 buffers, bf16

    tn = out_p
    while tn > 128 and ((out_p % tn) or per_step_weight_bytes(tn) > budget_bytes):
        tn -= 128
    return tn


def _lstm_cell_kernel(x_ref, h_ref, c_ref, wx_ref, wh_ref,
                      h_out_ref, c_out_ref, *, tn):
    # Fused gate pre-activations for this (batch-tile, hidden-tile):
    #   gates = x @ Wx_tile + h_prev @ Wh_tile   (bf16 operands, f32 accumulate)
    gates = jnp.dot(x_ref[...], wx_ref[...], preferred_element_type=jnp.float32)
    gates = gates + jnp.dot(h_ref[...], wh_ref[...],
                            preferred_element_type=jnp.float32)

    # Column layout inside this hidden tile: [ i | f | o | g ], each tn lanes.
    # Exact sigmoid via tanh: a single EUP op per element (no exp + recip),
    # and no approximation error injected into the gates.
    ifo = 0.5 * jnp.tanh(0.5 * gates[:, : 3 * tn]) + 0.5
    g = jnp.tanh(gates[:, 3 * tn:])

    i = ifo[:, :tn]
    f = ifo[:, tn: 2 * tn]
    o = ifo[:, 2 * tn:]

    c_prev = c_ref[...]
    c_out_ref[...] = f * c_prev + i * g
    # Matches the reference module exactly: tanh of the OLD cell state.
    h_out_ref[...] = o * jnp.tanh(c_prev)


def init_lstm_params(key, in_features, out_features):
    """Matches the PyTorch module init: U(-sqrt(1/out), sqrt(1/out)), stored
    in PyTorch orientation: W* -> (out, in), U* -> (out, out)."""
    bound = math.sqrt(1.0 / out_features)
    names_shapes = [
        ("Wi", (out_features, in_features)), ("Ui", (out_features, out_features)),
        ("Wf", (out_features, in_features)), ("Uf", (out_features, out_features)),
        ("Wg", (out_features, in_features)), ("Ug", (out_features, out_features)),
        ("Wo", (out_features, in_features)), ("Uo", (out_features, out_features)),
    ]
    keys = jax.random.split(key, len(names_shapes))
    params = {}
    for (name, shape), k in zip(names_shapes, keys):
        params[name] = jax.random.uniform(k, shape, jnp.float32,
                                          minval=-bound, maxval=bound)
    return params


def pack_weights(params, in_features, out_features):
    """Pack the 8 gate matrices into two padded bf16 matrices:

        wx : (in_p,  4*out_p)   (input weights,     K rows = padded in_features)
        wh : (out_p, 4*out_p)   (recurrent weights, K rows = padded out_features)

    Column layout, per hidden tile j of width tn: [ i_j | f_j | o_j | g_j ].
    tn comes from _pick_tn so it matches the tiling used by lstm_cell."""
    in_p = _round_up(in_features, 128)
    out_p = _round_up(out_features, 128)
    tn = _pick_tn(in_features, out_features)
    n_tiles = out_p // tn

    def pack(prefix, k_used, k_padded):
        w = jnp.zeros((k_padded, 4 * out_p), jnp.float32)
        for j in range(n_tiles):
            lo = j * tn
            width = min((j + 1) * tn, out_features) - lo
            if width <= 0:
                continue
            for gi, gate in enumerate("ifog"):
                m = params[prefix + gate]            # (out_features, k_used)
                col = j * 4 * tn + gi * tn
                w = w.at[:k_used, col:col + width].set(m[lo:lo + width, :].T)
        return w.astype(jnp.bfloat16)

    return pack("W", in_features, in_p), pack("U", out_features, out_p)


def _lstm_pallas(x_bf, h_bf, c_pad, wx, wh, *, tb, tn, single_buffer_weights):
    b_p, in_p = x_bf.shape
    out_p = c_pad.shape[1]
    n_h = out_p // tn          # hidden tiles (outer grid axis, weights constant
    n_b = b_p // tb            # over the inner batch sweep -> fetched once/tile)
    single_w = single_buffer_weights and n_h == 1

    def w_spec(k_rows):
        idx = lambda j, b: (0, j)
        if single_w:
            # Constant block index -> one VMEM copy is enough; halves the
            # dominant VMEM consumer (matters on v7x's 64 MiB VMEM).
            return pl.BlockSpec((k_rows, 4 * tn), idx,
                                pipeline_mode=pl.Buffered(1))
        return pl.BlockSpec((k_rows, 4 * tn), idx)

    # Explicit scoped-VMEM budget: weight block(s) + double-buffered activation,
    # cell-state and output tiles + headroom (defaults are 16/32 MiB).
    w_bufs = 1 if single_w else 2
    vmem_need = (w_bufs * (in_p + out_p) * 4 * tn * 2      # weight blocks (bf16)
                 + 2 * tb * (in_p + out_p) * 2             # x/h tiles (bf16)
                 + 2 * tb * tn * 4                          # c tiles (f32)
                 + 2 * 2 * tb * tn * 4)                     # h/c output tiles
    vmem_limit = int(min(max(vmem_need + (4 << 20), 32 << 20), 112 << 20))

    cost = pl.CostEstimate(
        flops=2 * b_p * (in_p + out_p) * 4 * out_p,
        transcendentals=5 * b_p * out_p,
        bytes_accessed=(x_bf.size * 2 + h_bf.size * 2 + c_pad.size * 4
                        + wx.size * 2 + wh.size * 2 + 2 * b_p * out_p * 4),
    )

    kernel = functools.partial(_lstm_cell_kernel, tn=tn)
    return pl.pallas_call(
        kernel,
        out_shape=(jax.ShapeDtypeStruct((b_p, out_p), jnp.float32),
                   jax.ShapeDtypeStruct((b_p, out_p), jnp.float32)),
        grid=(n_h, n_b),
        in_specs=[
            pl.BlockSpec((tb, in_p), lambda j, b: (b, 0)),
            pl.BlockSpec((tb, out_p), lambda j, b: (b, 0)),
            pl.BlockSpec((tb, tn), lambda j, b: (b, j)),
            w_spec(in_p),
            w_spec(out_p),
        ],
        out_specs=(
            pl.BlockSpec((tb, tn), lambda j, b: (b, j)),
            pl.BlockSpec((tb, tn), lambda j, b: (b, j)),
        ),
        input_output_aliases={2: 1},  # reuse the padded c_prev buffer for c_out
        compiler_params=pltpu.CompilerParams(
            dimension_semantics=("parallel", "parallel"),
            vmem_limit_bytes=vmem_limit),
        cost_estimate=cost,
    )(x_bf, h_bf, c_pad, wx, wh)


@functools.partial(jax.jit, static_argnames=("single_buffer_weights",))
def _lstm_cell_impl(x, h_prev, c_prev, wx, wh, single_buffer_weights=True):
    B, in_features = x.shape
    out_features = h_prev.shape[1]
    in_p = _round_up(in_features, 128)
    out_p = _round_up(out_features, 128)
    tn = _pick_tn(in_features, out_features)
    assert wx.shape == (in_p, 4 * out_p) and wh.shape == (out_p, 4 * out_p), \
        "packed weights do not match (in_features, out_features)"

    # Batch padding/tiling: multiple of 16 rows (bf16 sublane packing); >= 2
    # batch tiles so both v7x TensorCores get work; 128-row tiles for large B
    # (MXU-aligned, avoids padding awkward sizes up to a multiple of 256).
    b_p = _round_up(B, 16)
    if b_p <= 256:
        tb = max(8, b_p // 2)
    else:
        tb = 128
        b_p = _round_up(B, tb)

    # Two separate bf16 activation operands -- no [x|h] concat intermediate.
    x_bf = jnp.pad(x, ((0, b_p - B), (0, in_p - in_features))).astype(jnp.bfloat16)
    h_bf = jnp.pad(h_prev, ((0, b_p - B), (0, out_p - out_features))).astype(jnp.bfloat16)
    c_pad = jnp.pad(c_prev, ((0, b_p - B), (0, out_p - out_features)))

    h_full, c_full = _lstm_pallas(x_bf, h_bf, c_pad, wx, wh, tb=tb, tn=tn,
                                  single_buffer_weights=single_buffer_weights)
    return h_full[:B, :out_features], c_full[:B, :out_features]


def lstm_cell(x, h_prev, c_prev, wx, wh):
    """One LSTM-cell step (reference semantics: h = o * tanh(c_prev))."""
    try:
        out = _lstm_cell_impl(x, h_prev, c_prev, wx, wh,
                              single_buffer_weights=True)
        jax.block_until_ready(out)
        return out
    except Exception:
        # Fallback in case this JAX build rejects pl.Buffered(1) on a
        # pallas_call BlockSpec; default double-buffering is still correct.
        return _lstm_cell_impl(x, h_prev, c_prev, wx, wh,
                               single_buffer_weights=False)


def _reference_lstm_cell(x, h_prev, c_prev, p):
    sig = jax.nn.sigmoid
    i = sig(x @ p["Wi"].T + h_prev @ p["Ui"].T)
    f = sig(x @ p["Wf"].T + h_prev @ p["Uf"].T)
    g = jnp.tanh(x @ p["Wg"].T + h_prev @ p["Ug"].T)
    o = sig(x @ p["Wo"].T + h_prev @ p["Uo"].T)
    c = f * c_prev + i * g
    h = o * jnp.tanh(c_prev)
    return h, c


if __name__ == "__main__":
    B, in_features, out_features = 8, 16, 32

    key = jax.random.PRNGKey(0)
    k_param, k_x, k_h, k_c = jax.random.split(key, 4)

    params = init_lstm_params(k_param, in_features, out_features)
    wx, wh = pack_weights(params, in_features, out_features)

    x = jax.random.normal(k_x, (B, in_features), dtype=jnp.float32)

    # Path 1: state=None in the PyTorch module -> zero h_prev / c_prev.
    h0 = jnp.zeros((B, out_features), jnp.float32)
    c0 = jnp.zeros((B, out_features), jnp.float32)
    h1, c1 = lstm_cell(x, h0, c0, wx, wh)

    # Path 2: non-zero state so the recurrent (U) matmuls, f*c_prev and
    # tanh(c_prev) terms are actually exercised.
    h_prev = 0.5 * jax.random.normal(k_h, (B, out_features), dtype=jnp.float32)
    c_prev = 0.5 * jax.random.normal(k_c, (B, out_features), dtype=jnp.float32)
    h2, c2 = lstm_cell(x, h_prev, c_prev, wx, wh)

    jax.block_until_ready((h1, c1, h2, c2))

    h1_ref, c1_ref = _reference_lstm_cell(x, h0, c0, params)
    h2_ref, c2_ref = _reference_lstm_cell(x, h_prev, c_prev, params)

    # Exact (tanh-form) sigmoid; remaining error is only the bf16 cast of the
    # matmul operands (f32 accumulation), so tolerance is tighter than before.
    for got, want in ((h1, h1_ref), (c1, c1_ref), (h2, h2_ref), (c2, c2_ref)):
        err = float(jnp.max(jnp.abs(got - want)))
        assert jnp.allclose(got, want, atol=1e-2, rtol=1e-2), f"max abs err {err}"

    print("KERNEL_OK")
</pallas_src>

<mosaic_0001>
module attributes {stable_mosaic.version = 11 : i64} {
  func.func @_lstm_cell_kernel(%arg0: i32, %arg1: i32, %arg2: memref<8x128xbf16, #tpu.memory_space<vmem>>, %arg3: memref<8x128xbf16, #tpu.memory_space<vmem>>, %arg4: memref<8x128xf32, #tpu.memory_space<vmem>>, %arg5: memref<128x512xbf16, #tpu.memory_space<vmem>>, %arg6: memref<128x512xbf16, #tpu.memory_space<vmem>>, %arg7: memref<8x128xf32, #tpu.memory_space<vmem>>, %arg8: memref<8x128xf32, #tpu.memory_space<vmem>>) attributes {dimension_semantics = [#tpu.dimension_semantics<parallel>, #tpu.dimension_semantics<parallel>], iteration_bounds = array<i64: 1, 2>, scalar_prefetch = 0 : i64, scratch_operands = 0 : i64, tpu.core_type = #tpu.core_type<tc>, window_params = [{transform_indices = @transform_0, window_bounds = array<i64: 8, 128>}, {transform_indices = @transform_1, window_bounds = array<i64: 8, 128>}, {transform_indices = @transform_2, window_bounds = array<i64: 8, 128>}, {pipeline_mode = #tpu.pipeline_mode<synchronous>, transform_indices = @transform_3, window_bounds = array<i64: 128, 512>}, {pipeline_mode = #tpu.pipeline_mode<synchronous>, transform_indices = @transform_4, window_bounds = array<i64: 128, 512>}, {transform_indices = @transform_5, window_bounds = array<i64: 8, 128>}, {transform_indices = @transform_6, window_bounds = array<i64: 8, 128>}]} {
    %c0 = arith.constant 0 : index
    %c0_0 = arith.constant 0 : index
    %0 = vector.load %arg2[%c0, %c0_0] : memref<8x128xbf16, #tpu.memory_space<vmem>>, vector<8x128xbf16>
    %c0_1 = arith.constant 0 : index
    %c0_2 = arith.constant 0 : index
    %1 = vector.load %arg5[%c0_1, %c0_2] : memref<128x512xbf16, #tpu.memory_space<vmem>>, vector<128x512xbf16>
    %cst = arith.constant dense<0.000000e+00> : vector<8x512xf32>
    %2 = tpu.matmul %0, %1, %cst {dimension_numbers = #tpu.dot_dimension_numbers<[1], [0], [0], [1], [0, 0, 1, 1], [], []>} : vector<8x128xbf16>, vector<128x512xbf16>, vector<8x512xf32> -> vector<8x512xf32>
    %c0_3 = arith.constant 0 : index
    %c0_4 = arith.constant 0 : index
    %3 = vector.load %arg3[%c0_3, %c0_4] : memref<8x128xbf16, #tpu.memory_space<vmem>>, vector<8x128xbf16>
    %c0_5 = arith.constant 0 : index
    %c0_6 = arith.constant 0 : index
    %4 = vector.load %arg6[%c0_5, %c0_6] : memref<128x512xbf16, #tpu.memory_space<vmem>>, vector<128x512xbf16>
    %cst_7 = arith.constant dense<0.000000e+00> : vector<8x512xf32>
    %5 = tpu.matmul %3, %4, %cst_7 {dimension_numbers = #tpu.dot_dimension_numbers<[1], [0], [0], [1], [0, 0, 1, 1], [], []>} : vector<8x128xbf16>, vector<128x512xbf16>, vector<8x512xf32> -> vector<8x512xf32>
    %6 = arith.addf %2, %5 : vector<8x512xf32>
    %7 = vector.extract_strided_slice %6 {offsets = [0, 0], sizes = [8, 384], strides = [1, 1]} : vector<8x512xf32> to vector<8x384xf32>
    %cst_8 = arith.constant 5.000000e-01 : f32
    %8 = vector.broadcast %cst_8 : f32 to vector<8x384xf32>
    %9 = arith.mulf %8, %7 : vector<8x384xf32>
    %10 = math.tanh %9 : vector<8x384xf32>
    %cst_9 = arith.constant 5.000000e-01 : f32
    %11 = vector.broadcast %cst_9 : f32 to vector<8x384xf32>
    %12 = arith.mulf %11, %10 : vector<8x384xf32>
    %cst_10 = arith.constant 5.000000e-01 : f32
    %13 = vector.broadcast %cst_10 : f32 to vector<8x384xf32>
    %14 = arith.addf %12, %13 : vector<8x384xf32>
    %15 = vector.extract_strided_slice %6 {offsets = [0, 384], sizes = [8, 128], strides = [1, 1]} : vector<8x512xf32> to vector<8x128xf32>
    %16 = math.tanh %15 : vector<8x128xf32>
    %17 = vector.extract_strided_slice %14 {offsets = [0, 0], sizes = [8, 128], strides = [1, 1]} : vector<8x384xf32> to vector<8x128xf32>
    %18 = vector.extract_strided_slice %14 {offsets = [0, 128], sizes = [8, 128], strides = [1, 1]} : vector<8x384xf32> to vector<8x128xf32>
    %19 = vector.extract_strided_slice %14 {offsets = [0, 256], sizes = [8, 128], strides = [1, 1]} : vector<8x384xf32> to vector<8x128xf32>
    %c0_11 = arith.constant 0 : index
    %c0_12 = arith.constant 0 : index
    %20 = vector.load %arg4[%c0_11, %c0_12] : memref<8x128xf32, #tpu.memory_space<vmem>>, vector<8x128xf32>
    %21 = arith.mulf %18, %20 : vector<8x128xf32>
    %22 = arith.mulf %17, %16 : vector<8x128xf32>
    %23 = arith.addf %21, %22 : vector<8x128xf32>
    %c0_13 = arith.constant 0 : index
    %c0_14 = arith.constant 0 : index
    %24 = vector.load %arg8[%c0_13, %c0_14] : memref<8x128xf32, #tpu.memory_space<vmem>>, vector<8x128xf32>
    tpu.vector_store %arg8[%c0_13, %c0_14], %23 {strides = array<i32>} : memref<8x128xf32, #tpu.memory_space<vmem>>, vector<8x128xf32>,
    %25 = math.tanh %20 : vector<8x128xf32>
    %26 = arith.mulf %19, %25 : vector<8x128xf32>
    %c0_15 = arith.constant 0 : index
    %c0_16 = arith.constant 0 : index
    %27 = vector.load %arg7[%c0_15, %c0_16] : memref<8x128xf32, #tpu.memory_space<vmem>>, vector<8x128xf32>
    tpu.vector_store %arg7[%c0_15, %c0_16], %26 {strides = array<i32>} : memref<8x128xf32, #tpu.memory_space<vmem>>, vector<8x128xf32>,
    return
  }
  func.func @transform_0(%arg0: i32, %arg1: i32) -> (i32, i32) {
    %c0_i32 = arith.constant 0 : i32
    %c0_i32_0 = arith.constant 0 : i32
    return %arg1, %c0_i32 : i32, i32
  }
  func.func @transform_1(%arg0: i32, %arg1: i32) -> (i32, i32) {
    %c0_i32 = arith.constant 0 : i32
    %c0_i32_0 = arith.constant 0 : i32
    return %arg1, %c0_i32 : i32, i32
  }
  func.func @transform_2(%arg0: i32, %arg1: i32) -> (i32, i32) {
    %c0_i32 = arith.constant 0 : i32
    return %arg1, %arg0 : i32, i32
  }
  func.func @transform_3(%arg0: i32, %arg1: i32) -> (i32, i32) {
    %c0_i32 = arith.constant 0 : i32
    %c0_i32_0 = arith.constant 0 : i32
    return %c0_i32, %arg0 : i32, i32
  }
  func.func @transform_4(%arg0: i32, %arg1: i32) -> (i32, i32) {
    %c0_i32 = arith.constant 0 : i32
    %c0_i32_0 = arith.constant 0 : i32
    return %c0_i32, %arg0 : i32, i32
  }
  func.func @transform_5(%arg0: i32, %arg1: i32) -> (i32, i32) {
    %c0_i32 = arith.constant 0 : i32
    return %arg1, %arg0 : i32, i32
  }
  func.func @transform_6(%arg0: i32, %arg1: i32) -> (i32, i32) {
    %c0_i32 = arith.constant 0 : i32
    return %arg1, %arg0 : i32, i32
  }
}

module attributes {stable_mosaic.version = 11 : i64} {
  func.func @_lstm_cell_kernel(%arg0: i32, %arg1: i32, %arg2: memref<8x128xbf16, #tpu.memory_space<vmem>>, %arg3: memref<8x128xbf16, #tpu.memory_space<vmem>>, %arg4: memref<8x128xf32, #tpu.memory_space<vmem>>, %arg5: memref<128x512xbf16, #tpu.memory_space<vmem>>, %arg6: memref<128x512xbf16, #tpu.memory_space<vmem>>, %arg7: memref<8x128xf32, #tpu.memory_space<vmem>>, %arg8: memref<8x128xf32, #tpu.memory_space<vmem>>) attributes {dimension_semantics = [#tpu.dimension_semantics<parallel>, #tpu.dimension_semantics<parallel>], iteration_bounds = array<i64: 1, 2>, scalar_prefetch = 0 : i64, scratch_operands = 0 : i64, tpu.core_type = #tpu.core_type<tc>, window_params = [{transform_indices = @transform_0, window_bounds = array<i64: 8, 128>}, {transform_indices = @transform_1, window_bounds = array<i64: 8, 128>}, {transform_indices = @transform_2, window_bounds = array<i64: 8, 128>}, {transform_indices = @transform_3, window_bounds = array<i64: 128, 512>}, {transform_indices = @transform_4, window_bounds = array<i64: 128, 512>}, {transform_indices = @transform_5, window_bounds = array<i64: 8, 128>}, {transform_indices = @transform_6, window_bounds = array<i64: 8, 128>}]} {
    %c0 = arith.constant 0 : index
    %c0_0 = arith.constant 0 : index
    %0 = vector.load %arg2[%c0, %c0_0] : memref<8x128xbf16, #tpu.memory_space<vmem>>, vector<8x128xbf16>
    %c0_1 = arith.constant 0 : index
    %c0_2 = arith.constant 0 : index
    %1 = vector.load %arg5[%c0_1, %c0_2] : memref<128x512xbf16, #tpu.memory_space<vmem>>, vector<128x512xbf16>
    %cst = arith.constant dense<0.000000e+00> : vector<8x512xf32>
    %2 = tpu.matmul %0, %1, %cst {dimension_numbers = #tpu.dot_dimension_numbers<[1], [0], [0], [1], [0, 0, 1, 1], [], []>} : vector<8x128xbf16>, vector<128x512xbf16>, vector<8x512xf32> -> vector<8x512xf32>
    %c0_3 = arith.constant 0 : index
    %c0_4 = arith.constant 0 : index
    %3 = vector.load %arg3[%c0_3, %c0_4] : memref<8x128xbf16, #tpu.memory_space<vmem>>, vector<8x128xbf16>
    %c0_5 = arith.constant 0 : index
    %c0_6 = arith.constant 0 : index
    %4 = vector.load %arg6[%c0_5, %c0_6] : memref<128x512xbf16, #tpu.memory_space<vmem>>, vector<128x512xbf16>
    %cst_7 = arith.constant dense<0.000000e+00> : vector<8x512xf32>
    %5 = tpu.matmul %3, %4, %cst_7 {dimension_numbers = #tpu.dot_dimension_numbers<[1], [0], [0], [1], [0, 0, 1, 1], [], []>} : vector<8x128xbf16>, vector<128x512xbf16>, vector<8x512xf32> -> vector<8x512xf32>
    %6 = arith.addf %2, %5 : vector<8x512xf32>
    %7 = vector.extract_strided_slice %6 {offsets = [0, 0], sizes = [8, 384], strides = [1, 1]} : vector<8x512xf32> to vector<8x384xf32>
    %cst_8 = arith.constant 5.000000e-01 : f32
    %8 = vector.broadcast %cst_8 : f32 to vector<8x384xf32>
    %9 = arith.mulf %8, %7 : vector<8x384xf32>
    %10 = math.tanh %9 : vector<8x384xf32>
    %cst_9 = arith.constant 5.000000e-01 : f32
    %11 = vector.broadcast %cst_9 : f32 to vector<8x384xf32>
    %12 = arith.mulf %11, %10 : vector<8x384xf32>
    %cst_10 = arith.constant 5.000000e-01 : f32
    %13 = vector.broadcast %cst_10 : f32 to vector<8x384xf32>
    %14 = arith.addf %12, %13 : vector<8x384xf32>
    %15 = vector.extract_strided_slice %6 {offsets = [0, 384], sizes = [8, 128], strides = [1, 1]} : vector<8x512xf32> to vector<8x128xf32>
    %16 = math.tanh %15 : vector<8x128xf32>
    %17 = vector.extract_strided_slice %14 {offsets = [0, 0], sizes = [8, 128], strides = [1, 1]} : vector<8x384xf32> to vector<8x128xf32>
    %18 = vector.extract_strided_slice %14 {offsets = [0, 128], sizes = [8, 128], strides = [1, 1]} : vector<8x384xf32> to vector<8x128xf32>
    %19 = vector.extract_strided_slice %14 {offsets = [0, 256], sizes = [8, 128], strides = [1, 1]} : vector<8x384xf32> to vector<8x128xf32>
    %c0_11 = arith.constant 0 : index
    %c0_12 = arith.constant 0 : index
    %20 = vector.load %arg4[%c0_11, %c0_12] : memref<8x128xf32, #tpu.memory_space<vmem>>, vector<8x128xf32>
    %21 = arith.mulf %18, %20 : vector<8x128xf32>
    %22 = arith.mulf %17, %16 : vector<8x128xf32>
    %23 = arith.addf %21, %22 : vector<8x128xf32>
    %c0_13 = arith.constant 0 : index
    %c0_14 = arith.constant 0 : index
    %24 = vector.load %arg8[%c0_13, %c0_14] : memref<8x128xf32, #tpu.memory_space<vmem>>, vector<8x128xf32>
    tpu.vector_store %arg8[%c0_13, %c0_14], %23 {strides = array<i32>} : memref<8x128xf32, #tpu.memory_space<vmem>>, vector<8x128xf32>,
    %25 = math.tanh %20 : vector<8x128xf32>
    %26 = arith.mulf %19, %25 : vector<8x128xf32>
    %c0_15 = arith.constant 0 : index
    %c0_16 = arith.constant 0 : index
    %27 = vector.load %arg7[%c0_15, %c0_16] : memref<8x128xf32, #tpu.memory_space<vmem>>, vector<8x128xf32>
    tpu.vector_store %arg7[%c0_15, %c0_16], %26 {strides = array<i32>} : memref<8x128xf32, #tpu.memory_space<vmem>>, vector<8x128xf32>,
    return
  }
  func.func @transform_0(%arg0: i32, %arg1: i32) -> (i32, i32) {
    %c0_i32 = arith.constant 0 : i32
    %c0_i32_0 = arith.constant 0 : i32
    return %arg1, %c0_i32 : i32, i32
  }
  func.func @transform_1(%arg0: i32, %arg1: i32) -> (i32, i32) {
    %c0_i32 = arith.constant 0 : i32
    %c0_i32_0 = arith.constant 0 : i32
    return %arg1, %c0_i32 : i32, i32
  }
  func.func @transform_2(%arg0: i32, %arg1: i32) -> (i32, i32) {
    %c0_i32 = arith.constant 0 : i32
    return %arg1, %arg0 : i32, i32
  }
  func.func @transform_3(%arg0: i32, %arg1: i32) -> (i32, i32) {
    %c0_i32 = arith.constant 0 : i32
    %c0_i32_0 = arith.constant 0 : i32
    return %c0_i32, %arg0 : i32, i32
  }
  func.func @transform_4(%arg0: i32, %arg1: i32) -> (i32, i32) {
    %c0_i32 = arith.constant 0 : i32
    %c0_i32_0 = arith.constant 0 : i32
    return %c0_i32, %arg0 : i32, i32
  }
  func.func @transform_5(%arg0: i32, %arg1: i32) -> (i32, i32) {
    %c0_i32 = arith.constant 0 : i32
    return %arg1, %arg0 : i32, i32
  }
  func.func @transform_6(%arg0: i32, %arg1: i32) -> (i32, i32) {
    %c0_i32 = arith.constant 0 : i32
    return %arg1, %arg0 : i32, i32
  }
}

</mosaic_0001>

<bundles_post_ra>
// kernel: _lstm_cell_impl.1
= control target key start
LH: loop header
LB: loop body
LE: loop exit
PB: predicated region body
PF: predicated region fallthrough
CT: control target
= control target key end

     0   :  { %12 = vsyncpa [#allocation3], 0  ;;  %s1626_s0 = inlined_call_operand.vmem [shape: bf16[16,128], index: 0, kind: input, shape index: {}]   ;;  %s1627_s1 = inlined_call_operand.vmem [shape: bf16[16,128], index: 1, kind: input, shape index: {}]   ;;  %s1628_s2 = inlined_call_operand.vmem [shape: f32[16,128], index: 2, kind: input, shape index: {}, may-alias: {2,6}]   ;;  %s1629_s3 = inlined_call_operand.hbm [shape: bf16[128,512], index: 3, kind: input, shape index: {}]   ;;  %s1630_s4 = inlined_call_operand.hbm [shape: bf16[128,512], index: 4, kind: input, shape index: {}]   ;;  %s1631_s5 = inlined_call_operand.vmem [shape: f32[16,128], index: 5, kind: output, shape index: {0}]   ;;  %s1632_s6 = inlined_call_operand.vmem [shape: f32[16,128], index: 6, kind: output, shape index: {1}, may-alias: {2,6}]  }
   0x1   :  { %13 = vsyncpa [#allocation5], 0  ;;  %s1487_s21 = smov 0   ;;  %s1489_s22 = smov 0  }
   0x2   :  { %s1491_s23 = smov 0  }
   0x3 LB: > { %s1117_s24 = sadd.s32 4294967295, %s1445_s23   ;;  %s28_s25 = sadd.s32 1, %s1441_s22  ;;  %s1445_s23 = sphi %s1491_s23, %s19_s23   ;;  %s1441_s22 = sphi %s1489_s22, %s1642_s22   ;;  %s1437_s21 = sphi %s1487_s21, %s1641_s21  }
   0x4   : > { %p29_p0 = scmp.ge.s32.totalorder %s28_s25, 2  ;;  %p1119_p1 = scmp.ge.s32.totalorder %s1445_s23, 1 }
   0x5   : > { %p224_p2 = scmp.lt.s32.totalorder %s1445_s23, 3  ;;  %p1512_p4 = scmp.eq.s32.totalorder %s1117_s24, 0 }
   0x6   : > { %s1644_s25 = smov (%p29_p0, %s28_s25), 0  ;;  %s1447_s28 = smov [#allocation2]  }
   0x7   : > { %p1508_p3 = pnand %p1119_p1, %p224_p2  ;;  %s239_s29 = sshll.u32 %s1447_s28, 4  ;;  %s240_s29 = int_to_ptr.vmem [resolvable:$true] %s239_s29 }
   0x8   : > { %s1637_s27 = scalar_select %p1512_p4, 1, 0 }
   0x9   : > { %s1636_s26 = scalar_select %p1508_p3, 1, 0 }
   0xa   : > { %p1213_p5 = pneg %p1508_p3  ;;  %s1448_s7 = smov [#allocation4]  }
   0xb   : > { %s255_s8 = sshll.u32 %s1448_s7, 4  ;;  %s1359_s11 = scalar_lea.hbm %s1629_s3, 4096  ;;  %s1524_s8 = int_to_ptr.vmem [resolvable:$true] %s255_s8 }
   0xc   : > { %p1520_p6 = pnand %p1512_p4, %p1213_p5  ;;  %p1360_p7 = scmp.ne.s32.totalorder %s1629_s3, %s1359_s11 }
   0xd   : > { %p1366_p11 = scmp.lt.u32.totalorder %s1359_s11, %s1629_s3 }
   0xe   : > { %p1361_p8 = pneg %p1520_p6 }
  0x10   : > { %p1362_p9 = pnand %p1361_p8, %p1360_p7 }
  0x12   : > { %p1363_p10 = pneg %p1362_p9 }
  0x14   : > { %p1368_p12 = pnand %p1366_p11, %p1363_p10 }
  0x16   : > { %1371 = shalt.err (!%p1368_p12)
}
  0x17   : > { %s1372_s16 = scalar_lea.vmem %s240_s29, 4096  ;;  %p1380_p2 = scmp.lt.s32.totalorder %s240_s29, %s240_s29 }
  0x18   : > { %p1373_p13 = scmp.ne.s32.totalorder %s240_s29, %s1372_s16  ;;  %p1381_p5 = scmp.lt.s32.totalorder %s1372_s16, %s1372_s16 }
  0x1a   : > { %p1375_p0 = pnand %p1373_p13, %p1361_p8  ;;  %p1382_p4 = por %p1381_p5, %p1380_p2 }
  0x1c   : > { %p1376_p1 = pneg %p1375_p0 }
  0x1e   : > { %p1383_p3 = pnand %p1382_p4, %p1376_p1 }
  0x20   : > { %1386 = shalt.err (!%p1383_p3)
}
  0x21   : > { %s1449_s17 = smov 256   ;;  %s1450_s18 = smov 16  }
  0x22   : > { %1216 = dma.hbm_to_vmem [thread:$0]  (!%p1520_p6), %s1629_s3, 4096, %s240_s29, [#allocation3], %s1449_s17, %s1449_s17, %s1450_s18  }
  0x23   : > { %s1387_s7 = scalar_lea.hbm %s1630_s4, 4096 }
  0x24   : > { %p1388_p7 = scmp.ne.s32.totalorder %s1630_s4, %s1387_s7  ;;  %p1394_p9 = scmp.lt.u32.totalorder %s1387_s7, %s1630_s4 }
  0x26   : > { %p1390_p3 = pnand %p1388_p7, %p1361_p8 }
  0x28   : > { %p1391_p4 = pneg %p1390_p3 }
  0x2a   : > { %p1396_p10 = pnand %p1394_p9, %p1391_p4 }
  0x2c   : > { %1399 = shalt.err (!%p1396_p10)
}
  0x2d   : > { %s1400_s29 = scalar_lea.vmem %s1524_s8, 4096  ;;  %p1408_p0 = scmp.lt.s32.totalorder %s1524_s8, %s1524_s8 }
  0x2e   : > { %p1401_p11 = scmp.ne.s32.totalorder %s1524_s8, %s1400_s29  ;;  %p1409_p1 = scmp.lt.s32.totalorder %s1400_s29, %s1400_s29 }
  0x30   : > { %p1403_p12 = pnand %p1401_p11, %p1361_p8  ;;  %p1410_p2 = por %p1409_p1, %p1408_p0 }
  0x32   : > { %p1404_p13 = pneg %p1403_p12 }
  0x34   : > { %p1411_p5 = pnand %p1410_p2, %p1404_p13 }
  0x36   : > { %1414 = shalt.err (!%p1411_p5)
}
  0x37   : > { %1219 = dma.hbm_to_vmem [thread:$0]  (!%p1520_p6), %s1630_s4, 4096, %s1524_s8, [#allocation5], %s1449_s17, %s1449_s17, %s1450_s18  }
  0x38   : > { %p1639_p7 = scmp.ne.s32.totalorder %s1636_s26, 0 }
  0x39   : > { %p1640_p3 = scmp.ne.s32.totalorder (!%p1639_p7), %s1637_s27, 0 }
  0x3a   : > { %295 = sbr.rel (%p1639_p7) target bundleno = 370 (0x172), region = 40 }
  0x41   : > { %1428 = dma.done.wait (%p1640_p3), [#allocation3], 4096  }
  0x42   : > { %1430 = vsyncadd (%p1640_p3), [#allocation3], 4294963200 }
  0x43   : > { %1432 = dma.done.wait (%p1640_p3), [#allocation5], 4096  }
  0x44   : > { %1434 = vsyncadd (%p1640_p3), [#allocation5], 4294963200  ;;  %v1451_v0 = vmov 0   ;;  %v1253_v1 = vld [vmem:[#allocation4 + $0x4] ss:$16 sps:$4 sm:$0xff]   ;;  %p348_p6 = scmp.lt.s32.totalorder %s1437_s21, 1 }
  0x45   : > { %638 = vmatprep.mubr.bf16.mxu0 %v1451_v0  ;;  %679 = vmatprep.mubr.bf16.mxu1 %v1451_v0  ;;  %v1255_v2 = vld [vmem:[#allocation4 + $0xc] ss:$16 sps:$4 sm:$0xff]   ;;  %v1257_v3 = vld [vmem:[#allocation4] ss:$16 sps:$4 sm:$0xff]   ;;  %v1258_v4 = vld [vmem:[#allocation4 + $0x8] ss:$16 sps:$4 sm:$0xff]  }
  0x46   : > { %606 = vmatprep.subr.bf16.mxu0 %v1253_v1  ;;  %647 = vmatprep.subr.bf16.mxu1 %v1255_v2  ;;  %v1259_v5 = vld [vmem:[#allocation4 + $0x24] ss:$16 sps:$4 sm:$0xff]   ;;  %v1261_v6 = vld [vmem:[#allocation4 + $0x2c] ss:$16 sps:$4 sm:$0xff]   ;;  %v1263_v7 = vld [vmem:[#allocation4 + $0x20] ss:$16 sps:$4 sm:$0xff]  }
  0x47   : > { %607 = vmatpush1.bf16.msra.mxu0 %v1257_v3  ;;  %648 = vmatpush1.bf16.msra.mxu1 %v1258_v4  ;;  %v1264_v8 = vld [vmem:[#allocation4 + $0x28] ss:$16 sps:$4 sm:$0xff]   ;;  %v1265_v9 = vld [vmem:[#allocation4 + $0x44] ss:$16 sps:$4 sm:$0xff]   ;;  %v1267_v10 = vld [vmem:[#allocation4 + $0x4c] ss:$16 sps:$4 sm:$0xff]  }
  0x48   : > { %608 = vmatprep.subr.bf16.mxu0 %v1259_v5  ;;  %649 = vmatprep.subr.bf16.mxu1 %v1261_v6  ;;  %v1269_v11 = vld [vmem:[#allocation4 + $0x40] ss:$16 sps:$4 sm:$0xff]   ;;  %v1270_v12 = vld [vmem:[#allocation4 + $0x48] ss:$16 sps:$4 sm:$0xff]   ;;  %v1271_v13 = vld [vmem:[#allocation4 + $0x64] ss:$16 sps:$4 sm:$0xff]  }
  0x49   : > { %v1273_v14 = vld [vmem:[#allocation4 + $0x6c] ss:$16 sps:$4 sm:$0xff]   ;;  %v1275_v15 = vld [vmem:[#allocation4 + $0x60] ss:$16 sps:$4 sm:$0xff]   ;;  %v1276_v16 = vld [vmem:[#allocation4 + $0x68] ss:$16 sps:$4 sm:$0xff]  }
  0x4a   : > { %v1277_v17 = vld [vmem:[#allocation4 + $0x84] ss:$16 sps:$4 sm:$0xff]   ;;  %v1279_v18 = vld [vmem:[#allocation4 + $0x8c] ss:$16 sps:$4 sm:$0xff]   ;;  %v1281_v19 = vld [vmem:[#allocation4 + $0x80] ss:$16 sps:$4 sm:$0xff]  }
  0x4b   : > { %609 = vmatpush1.bf16.msra.mxu0 %v1263_v7  ;;  %650 = vmatpush1.bf16.msra.mxu1 %v1264_v8  ;;  %v1282_v20 = vld [vmem:[#allocation4 + $0x88] ss:$16 sps:$4 sm:$0xff]   ;;  %v1283_v21 = vld [vmem:[#allocation4 + $0xa4] ss:$16 sps:$4 sm:$0xff]   ;;  %v1285_v22 = vld [vmem:[#allocation4 + $0xac] ss:$16 sps:$4 sm:$0xff]  }
  0x4c   : > { %610 = vmatprep.subr.bf16.mxu0 %v1265_v9  ;;  %651 = vmatprep.subr.bf16.mxu1 %v1267_v10  ;;  %v1287_v23 = vld [vmem:[#allocation4 + $0xa0] ss:$16 sps:$4 sm:$0xff]   ;;  %v1288_v24 = vld [vmem:[#allocation4 + $0xa8] ss:$16 sps:$4 sm:$0xff]   ;;  %v1289_v25 = vld [vmem:[#allocation4 + $0xc4] ss:$16 sps:$4 sm:$0xff]  }
  0x4d   : > { %v1291_v26 = vld [vmem:[#allocation4 + $0xcc] ss:$16 sps:$4 sm:$0xff]   ;;  %s1646_s21 = smov (!%p348_p6, %s1437_s21), 1  ;;  %v1293_v27 = vld [vmem:[#allocation4 + $0xc0] ss:$16 sps:$4 sm:$0xff]  }
  0x4e   : > { %v1294_v28 = vld [vmem:[#allocation4 + $0xc8] ss:$16 sps:$4 sm:$0xff]   ;;  %v1295_v29 = vld [vmem:[#allocation4 + $0xe4] ss:$16 sps:$4 sm:$0xff]   ;;  %v1297_v30 = vld [vmem:[#allocation4 + $0xec] ss:$16 sps:$4 sm:$0xff]  }
  0x4f   : > { %611 = vmatpush1.bf16.msra.mxu0 %v1269_v11  ;;  %652 = vmatpush1.bf16.msra.mxu1 %v1270_v12  ;;  %s1126_s26 = sshll.u32 %s1646_s21, 2  ;;  %v1299_v31 = vld [vmem:[#allocation4 + $0xe0] ss:$16 sps:$4 sm:$0xff]   ;;  %v1300_v32 = vld [vmem:[#allocation4 + $0xe8] ss:$16 sps:$4 sm:$0xff]   ;;  %s1603_s18 = sshll.u32 %s1646_s21, 3 }
  0x50   : > { %612 = vmatprep.subr.bf16.mxu0 %v1271_v13  ;;  %653 = vmatprep.subr.bf16.mxu1 %v1273_v14  ;;  %v1303_v33 = vld [vmem:[#allocation2 + $0x4] ss:$16 sps:$4 sm:$0xff]   ;;  %v1306_v34 = vld [vmem:[#allocation2 + $0xc] ss:$16 sps:$4 sm:$0xff]   ;;  %s355_s8 = scalar_lea.vmem %s1627_s1, %s1126_s26  ;;  %v1301_v35 = vld [vmem:[#allocation2] ss:$16 sps:$4 sm:$0xff]   ;;  %s351_s17 = scalar_lea.vmem %s1626_s0, %s1126_s26 }
  0x51   : > { %v1304_v36 = vld [vmem:[#allocation2 + $0x8] ss:$16 sps:$4 sm:$0xff]   ;;  %v413_v37 = vld [vmem:[%s355_s8] sm:$0xf]  ;;  %v1309_v38 = vld [vmem:[#allocation2 + $0x24] ss:$16 sps:$4 sm:$0xff]   ;;  %s362_s24 = scalar_lea.vmem %s1628_s2, %s1603_s18  ;;  %s371_s7 = scalar_lea.vmem %s1631_s5, %s1603_s18 }
  0x52   : > { %v1312_v39 = vld [vmem:[#allocation2 + $0x2c] ss:$16 sps:$4 sm:$0xff]   ;;  %v1307_v40 = vld [vmem:[#allocation2 + $0x20] ss:$16 sps:$4 sm:$0xff]   ;;  %v1310_v41 = vld [vmem:[#allocation2 + $0x28] ss:$16 sps:$4 sm:$0xff]   ;;  %s378_s11 = scalar_lea.vmem %s1632_s6, %s1603_s18 }
  0x53   : > { %613 = vmatpush1.bf16.msra.mxu0 %v1275_v15  ;;  %654 = vmatpush1.bf16.msra.mxu1 %v1276_v16  ;;  %v1315_v42 = vld [vmem:[#allocation2 + $0x44] ss:$16 sps:$4 sm:$0xff]   ;;  %v1318_v43 = vld [vmem:[#allocation2 + $0x4c] ss:$16 sps:$4 sm:$0xff]   ;;  %v1313_v44 = vld [vmem:[#allocation2 + $0x40] ss:$16 sps:$4 sm:$0xff]  }
  0x54   : > { %614 = vmatprep.subr.bf16.mxu0 %v1277_v17  ;;  %655 = vmatprep.subr.bf16.mxu1 %v1279_v18  ;;  %v1316_v45 = vld [vmem:[#allocation2 + $0x48] ss:$16 sps:$4 sm:$0xff]   ;;  %v1321_v46 = vld [vmem:[#allocation2 + $0x64] ss:$16 sps:$4 sm:$0xff]   ;;  %v1324_v47 = vld [vmem:[#allocation2 + $0x6c] ss:$16 sps:$4 sm:$0xff]  }
  0x55   : > { %v1319_v48 = vld [vmem:[#allocation2 + $0x60] ss:$16 sps:$4 sm:$0xff]   ;;  %v1322_v49 = vld [vmem:[#allocation2 + $0x68] ss:$16 sps:$4 sm:$0xff]   ;;  %v1327_v50 = vld [vmem:[#allocation2 + $0x84] ss:$16 sps:$4 sm:$0xff]  }
  0x56   : > { %v1330_v51 = vld [vmem:[#allocation2 + $0x8c] ss:$16 sps:$4 sm:$0xff]   ;;  %v1325_v52 = vld [vmem:[#allocation2 + $0x80] ss:$16 sps:$4 sm:$0xff]   ;;  %v1328_v53 = vld [vmem:[#allocation2 + $0x88] ss:$16 sps:$4 sm:$0xff]  }
  0x57   : > { %615 = vmatpush1.bf16.msra.mxu0 %v1281_v19  ;;  %656 = vmatpush1.bf16.msra.mxu1 %v1282_v20  ;;  %v1333_v54 = vld [vmem:[#allocation2 + $0xa4] ss:$16 sps:$4 sm:$0xff]   ;;  %v1336_v55 = vld [vmem:[#allocation2 + $0xac] ss:$16 sps:$4 sm:$0xff]   ;;  %v1331_v56 = vld [vmem:[#allocation2 + $0xa0] ss:$16 sps:$4 sm:$0xff]  }
  0x58   : > { %616 = vmatprep.subr.bf16.mxu0 %v1283_v21  ;;  %657 = vmatprep.subr.bf16.mxu1 %v1285_v22  ;;  %v1334_v57 = vld [vmem:[#allocation2 + $0xa8] ss:$16 sps:$4 sm:$0xff]   ;;  %v1339_v58 = vld [vmem:[#allocation2 + $0xc4] ss:$16 sps:$4 sm:$0xff]   ;;  %v1342_v59 = vld [vmem:[#allocation2 + $0xcc] ss:$16 sps:$4 sm:$0xff]  }
  0x59   : > { %v1337_v60 = vld [vmem:[#allocation2 + $0xc0] ss:$16 sps:$4 sm:$0xff]   ;;  %v1340_v61 = vld [vmem:[#allocation2 + $0xc8] ss:$16 sps:$4 sm:$0xff]   ;;  %v1345_v62 = vld [vmem:[#allocation2 + $0xe4] ss:$16 sps:$4 sm:$0xff]  }
  0x5a   : > { %v1348_v63 = vld [vmem:[#allocation2 + $0xec] ss:$16 sps:$4 sm:$0xff]   ;;  %v1346_v1 = vld [vmem:[#allocation2 + $0xe8] ss:$16 sps:$4 sm:$0xff]   ;;  %v380_v2 = vld [vmem:[%s351_s17] sm:$0xf] }
  0x5b   : > { %617 = vmatpush1.bf16.msra.mxu0 %v1287_v23  ;;  %658 = vmatpush1.bf16.msra.mxu1 %v1288_v24  ;;  %v943_v12 = vld [vmem:[%s362_s24] sm:$0xff] }
  0x5c   : > { %618 = vmatprep.subr.bf16.mxu0 %v1289_v25  ;;  %659 = vmatprep.subr.bf16.mxu1 %v1291_v26 }
  0x5f   : > { %619 = vmatpush1.bf16.msra.mxu0 %v1293_v27  ;;  %660 = vmatpush1.bf16.msra.mxu1 %v1294_v28 }
  0x60   : > { %620 = vmatprep.subr.bf16.mxu0 %v1295_v29  ;;  %661 = vmatprep.subr.bf16.mxu1 %v1297_v30 }
  0x63   : > { %621 = vmatpush1.bf16.msra.mxu0 %v1299_v31  ;;  %662 = vmatpush1.bf16.msra.mxu1 %v1300_v32 }
  0x64   : > { %848 = vmatprep.subr.bf16.mxu0 %v1303_v33  ;;  %889 = vmatprep.subr.bf16.mxu1 %v1306_v34 }
  0x66   : > { %639 = vmatmul.mubr.bf16.vlgmr.msra.gmra.mrb[0].mxu0 %v413_v37  ;;  %680 = vmatmul.mubr.bf16.vlgmr.msra.gmra.mrb[0].mxu1 %v413_v37 }
  0x67   : > { %849 = vmatpush1.bf16.msra.mxu0 %v1301_v35  ;;  %890 = vmatpush1.bf16.msra.mxu1 %v1304_v36 }
  0x68   : > { %850 = vmatprep.subr.bf16.mxu0 %v1309_v38  ;;  %891 = vmatprep.subr.bf16.mxu1 %v1312_v39 }
  0x69   : > { %880 = vmatprep.mubr.bf16.mxu0 %v1451_v0  ;;  %921 = vmatprep.mubr.bf16.mxu1 %v1451_v0  ;;  %v1343_v0 = vld [vmem:[#allocation2 + $0xe0] ss:$16 sps:$4 sm:$0xff]  }
  0x6b   : > { %851 = vmatpush1.bf16.msra.mxu0 %v1307_v40  ;;  %892 = vmatpush1.bf16.msra.mxu1 %v1310_v41 }
  0x6c   : > { %852 = vmatprep.subr.bf16.mxu0 %v1315_v42  ;;  %893 = vmatprep.subr.bf16.mxu1 %v1318_v43 }
  0x6f   : > { %853 = vmatpush1.bf16.msra.mxu0 %v1313_v44  ;;  %894 = vmatpush1.bf16.msra.mxu1 %v1316_v45 }
  0x70   : > { %854 = vmatprep.subr.bf16.mxu0 %v1321_v46  ;;  %895 = vmatprep.subr.bf16.mxu1 %v1324_v47 }
  0x73   : > { %855 = vmatpush1.bf16.msra.mxu0 %v1319_v48  ;;  %896 = vmatpush1.bf16.msra.mxu1 %v1322_v49 }
  0x74   : > { %856 = vmatprep.subr.bf16.mxu0 %v1327_v50  ;;  %897 = vmatprep.subr.bf16.mxu1 %v1330_v51 }
  0x77   : > { %857 = vmatpush1.bf16.msra.mxu0 %v1325_v52  ;;  %898 = vmatpush1.bf16.msra.mxu1 %v1328_v53 }
  0x78   : > { %858 = vmatprep.subr.bf16.mxu0 %v1333_v54  ;;  %899 = vmatprep.subr.bf16.mxu1 %v1336_v55 }
  0x7b   : > { %859 = vmatpush1.bf16.msra.mxu0 %v1331_v56  ;;  %900 = vmatpush1.bf16.msra.mxu1 %v1334_v57 }
  0x7c   : > { %860 = vmatprep.subr.bf16.mxu0 %v1339_v58  ;;  %901 = vmatprep.subr.bf16.mxu1 %v1342_v59 }
  0x7f   : > { %861 = vmatpush1.bf16.msra.mxu0 %v1337_v60  ;;  %902 = vmatpush1.bf16.msra.mxu1 %v1340_v61 }
  0x80   : > { %862 = vmatprep.subr.bf16.mxu0 %v1345_v62  ;;  %903 = vmatprep.subr.bf16.mxu1 %v1348_v63 }
  0x83   : > { %863 = vmatpush1.bf16.msra.mxu0 %v1343_v0  ;;  %904 = vmatpush1.bf16.msra.mxu1 %v1346_v1 }
  0x86   : > { %881 = vmatmul.mubr.bf16.vlgmr.msra.gmra.mrb[0].mxu0 %v380_v2  ;;  %922 = vmatmul.mubr.bf16.vlgmr.msra.gmra.mrb[0].mxu1 %v380_v2 }
 0x159   : > { %v882_v3 = vpop.f32.mrb[0].mxu0  ;;  %v923_v4 = vpop.f32.mrb[0].mxu1 }
 0x15a   : > { %v930_v5 = vmul.f32 0.5, %v882_v3  ;;  %v932_v6 = vmul.f32 0.5, %v923_v4  ;;  %v884_v7 = vpop.f32.mrb[1].mxu0  ;;  %v925_v8 = vpop.f32.mrb[1].mxu1 }
 0x15b   : > { %v931_v9 = vmul.f32 0.5, %v884_v7  ;;  %v886_v10 = vpop.f32.mrb[2].mxu0  ;;  %v927_v11 = vpop.f32.mrb[2].mxu1 }
 0x15c   : > { %1349 = vtanh.f32 %v930_v5  ;;  %v887_v13 = vpop.f32.mrb[3].mxu0  ;;  %v928_v14 = vpop.f32.mrb[3].mxu1 }
 0x15d   : > { %1351 = vtanh.f32 %v932_v6 }
 0x15e   : > { %1353 = vtanh.f32 %v931_v9 }
 0x15f   : > { %1355 = vtanh.f32 %v943_v12 }
 0x160   : > { %1357 = vtanh.f32 %v925_v8 }
 0x166   : > { %v1350_v15 = vpop.eup %1349 }
 0x167   : > { %v1352_v16 = vpop.eup %1351  ;;  %v936_v17 = vmul.f32 0.5, %v1350_v15 }
 0x168   : > { %v1354_v18 = vpop.eup %1353  ;;  %v938_v19 = vmul.f32 0.5, %v1352_v16 }
 0x169   : > { %v1356_v20 = vpop.eup %1355  ;;  %v939_v21 = vadd.f32 0.5, %v936_v17  ;;  %v937_v22 = vmul.f32 0.5, %v1354_v18 }
 0x16a   : > { %v1358_v23 = vpop.eup %1357  ;;  %v941_v24 = vadd.f32 0.5, %v938_v19 }
 0x16b   : > { %v940_v25 = vadd.f32 0.5, %v937_v22  ;;  %v945_v26 = vmul.f32 %v1358_v23, %v939_v21 }
 0x16c   : > { %v949_v27 = vmul.f32 %v1356_v20, %v941_v24 }
 0x16d   : > { %v944_v28 = vmul.f32 %v943_v12, %v940_v25 }
 0x16e   : > { %950 = vst [vmem:[%s371_s7] sm:$0xff] %v949_v27 }
 0x16f   : > { %v946_v29 = vadd.f32 %v945_v26, %v944_v28 }
 0x171   : > { %947 = vst [vmem:[%s378_s11] sm:$0xff] %v946_v29 }
 0x172 PF: > { %s19_s23 = sadd.s32 1, %s1445_s23   ;;  %s1641_s21 = smov %s1441_s22 }
 0x173   : > { %p16_p8 = scmp.ge.s32.totalorder %s19_s23, 4   ;;  %s1642_s22 = smov %s1644_s25 }
 0x175   :  { %18 = sbr.rel (!%p16_p8) target bundleno = 3 (0x3), region = 99 }
 0x17c   :  { %996 = vsyncpa [#allocation3], 1 }
 0x17d   :  { %998 = vsyncpa [#allocation3 + $0x1], 1 }
 0x17e   :  { %999 = vsyncpa [#allocation5], 1 }

// kernel: _lstm_cell_impl.1
= control target key start
LH: loop header
LB: loop body
LE: loop exit
PB: predicated region body
PF: predicated region fallthrough
CT: control target
= control target key end

     0   :  { %12 = vsyncpa [#allocation3], 0  ;;  %s1626_s0 = inlined_call_operand.vmem [shape: bf16[16,128], index: 0, kind: input, shape index: {}]   ;;  %s1627_s1 = inlined_call_operand.vmem [shape: bf16[16,128], index: 1, kind: input, shape index: {}]   ;;  %s1628_s2 = inlined_call_operand.vmem [shape: f32[16,128], index: 2, kind: input, shape index: {}, may-alias: {2,6}]   ;;  %s1629_s3 = inlined_call_operand.hbm [shape: bf16[128,512], index: 3, kind: input, shape index: {}]   ;;  %s1630_s4 = inlined_call_operand.hbm [shape: bf16[128,512], index: 4, kind: input, shape index: {}]   ;;  %s1631_s5 = inlined_call_operand.vmem [shape: f32[16,128], index: 5, kind: output, shape index: {0}]   ;;  %s1632_s6 = inlined_call_operand.vmem [shape: f32[16,128], index: 6, kind: output, shape index: {1}, may-alias: {2,6}]  }
   0x1   :  { %13 = vsyncpa [#allocation5], 0  ;;  %s1487_s21 = smov 0   ;;  %s1489_s22 = smov 0  }
   0x2   :  { %s1491_s23 = smov 0  }
   0x3 LB: > { %s1117_s24 = sadd.s32 4294967295, %s1445_s23   ;;  %s28_s25 = sadd.s32 1, %s1441_s22  ;;  %s1445_s23 = sphi %s1491_s23, %s19_s23   ;;  %s1441_s22 = sphi %s1489_s22, %s1642_s22   ;;  %s1437_s21 = sphi %s1487_s21, %s1641_s21  }
   0x4   : > { %p29_p0 = scmp.ge.s32.totalorder %s28_s25, 2  ;;  %p1119_p1 = scmp.ge.s32.totalorder %s1445_s23, 1 }
   0x5   : > { %p224_p2 = scmp.lt.s32.totalorder %s1445_s23, 3  ;;  %p1512_p4 = scmp.eq.s32.totalorder %s1117_s24, 0 }
   0x6   : > { %s1644_s25 = smov (%p29_p0, %s28_s25), 0  ;;  %s1447_s28 = smov [#allocation2]  }
   0x7   : > { %p1508_p3 = pnand %p1119_p1, %p224_p2  ;;  %s239_s29 = sshll.u32 %s1447_s28, 4  ;;  %s240_s29 = int_to_ptr.vmem [resolvable:$true] %s239_s29 }
   0x8   : > { %s1637_s27 = scalar_select %p1512_p4, 1, 0 }
   0x9   : > { %s1636_s26 = scalar_select %p1508_p3, 1, 0 }
   0xa   : > { %p1213_p5 = pneg %p1508_p3  ;;  %s1448_s7 = smov [#allocation4]  }
   0xb   : > { %s255_s8 = sshll.u32 %s1448_s7, 4  ;;  %s1359_s11 = scalar_lea.hbm %s1629_s3, 4096  ;;  %s1524_s8 = int_to_ptr.vmem [resolvable:$true] %s255_s8 }
   0xc   : > { %p1520_p6 = pnand %p1512_p4, %p1213_p5  ;;  %p1360_p7 = scmp.ne.s32.totalorder %s1629_s3, %s1359_s11 }
   0xd   : > { %p1366_p11 = scmp.lt.u32.totalorder %s1359_s11, %s1629_s3 }
   0xe   : > { %p1361_p8 = pneg %p1520_p6 }
  0x10   : > { %p1362_p9 = pnand %p1361_p8, %p1360_p7 }
  0x12   : > { %p1363_p10 = pneg %p1362_p9 }
  0x14   : > { %p1368_p12 = pnand %p1366_p11, %p1363_p10 }
  0x16   : > { %1371 = shalt.err (!%p1368_p12)
}
  0x17   : > { %s1372_s16 = scalar_lea.vmem %s240_s29, 4096  ;;  %p1380_p2 = scmp.lt.s32.totalorder %s240_s29, %s240_s29 }
  0x18   : > { %p1373_p13 = scmp.ne.s32.totalorder %s240_s29, %s1372_s16  ;;  %p1381_p5 = scmp.lt.s32.totalorder %s1372_s16, %s1372_s16 }
  0x1a   : > { %p1375_p0 = pnand %p1373_p13, %p1361_p8  ;;  %p1382_p4 = por %p1381_p5, %p1380_p2 }
  0x1c   : > { %p1376_p1 = pneg %p1375_p0 }
  0x1e   : > { %p1383_p3 = pnand %p1382_p4, %p1376_p1 }
  0x20   : > { %1386 = shalt.err (!%p1383_p3)
}
  0x21   : > { %s1449_s17 = smov 256   ;;  %s1450_s18 = smov 16  }
  0x22   : > { %1216 = dma.hbm_to_vmem [thread:$0]  (!%p1520_p6), %s1629_s3, 4096, %s240_s29, [#allocation3], %s1449_s17, %s1449_s17, %s1450_s18  }
  0x23   : > { %s1387_s7 = scalar_lea.hbm %s1630_s4, 4096 }
  0x24   : > { %p1388_p7 = scmp.ne.s32.totalorder %s1630_s4, %s1387_s7  ;;  %p1394_p9 = scmp.lt.u32.totalorder %s1387_s7, %s1630_s4 }
  0x26   : > { %p1390_p3 = pnand %p1388_p7, %p1361_p8 }
  0x28   : > { %p1391_p4 = pneg %p1390_p3 }
  0x2a   : > { %p1396_p10 = pnand %p1394_p9, %p1391_p4 }
  0x2c   : > { %1399 = shalt.err (!%p1396_p10)
}
  0x2d   : > { %s1400_s29 = scalar_lea.vmem %s1524_s8, 4096  ;;  %p1408_p0 = scmp.lt.s32.totalorder %s1524_s8, %s1524_s8 }
  0x2e   : > { %p1401_p11 = scmp.ne.s32.totalorder %s1524_s8, %s1400_s29  ;;  %p1409_p1 = scmp.lt.s32.totalorder %s1400_s29, %s1400_s29 }
  0x30   : > { %p1403_p12 = pnand %p1401_p11, %p1361_p8  ;;  %p1410_p2 = por %p1409_p1, %p1408_p0 }
  0x32   : > { %p1404_p13 = pneg %p1403_p12 }
  0x34   : > { %p1411_p5 = pnand %p1410_p2, %p1404_p13 }
  0x36   : > { %1414 = shalt.err (!%p1411_p5)
}
  0x37   : > { %1219 = dma.hbm_to_vmem [thread:$0]  (!%p1520_p6), %s1630_s4, 4096, %s1524_s8, [#allocation5], %s1449_s17, %s1449_s17, %s1450_s18  }
  0x38   : > { %p1639_p7 = scmp.ne.s32.totalorder %s1636_s26, 0 }
  0x39   : > { %p1640_p3 = scmp.ne.s32.totalorder (!%p1639_p7), %s1637_s27, 0 }
  0x3a   : > { %295 = sbr.rel (%p1639_p7) target bundleno = 370 (0x172), region = 40 }
  0x41   : > { %1428 = dma.done.wait (%p1640_p3), [#allocation3], 4096  }
  0x42   : > { %1430 = vsyncadd (%p1640_p3), [#allocation3], 4294963200 }
  0x43   : > { %1432 = dma.done.wait (%p1640_p3), [#allocation5], 4096  }
  0x44   : > { %1434 = vsyncadd (%p1640_p3), [#allocation5], 4294963200  ;;  %v1451_v0 = vmov 0   ;;  %v1253_v1 = vld [vmem:[#allocation4 + $0x4] ss:$16 sps:$4 sm:$0xff]   ;;  %p348_p6 = scmp.lt.s32.totalorder %s1437_s21, 1 }
  0x45   : > { %638 = vmatprep.mubr.bf16.mxu0 %v1451_v0  ;;  %679 = vmatprep.mubr.bf16.mxu1 %v1451_v0  ;;  %v1255_v2 = vld [vmem:[#allocation4 + $0xc] ss:$16 sps:$4 sm:$0xff]   ;;  %v1257_v3 = vld [vmem:[#allocation4] ss:$16 sps:$4 sm:$0xff]   ;;  %v1258_v4 = vld [vmem:[#allocation4 + $0x8] ss:$16 sps:$4 sm:$0xff]  }
  0x46   : > { %606 = vmatprep.subr.bf16.mxu0 %v1253_v1  ;;  %647 = vmatprep.subr.bf16.mxu1 %v1255_v2  ;;  %v1259_v5 = vld [vmem:[#allocation4 + $0x24] ss:$16 sps:$4 sm:$0xff]   ;;  %v1261_v6 = vld [vmem:[#allocation4 + $0x2c] ss:$16 sps:$4 sm:$0xff]   ;;  %v1263_v7 = vld [vmem:[#allocation4 + $0x20] ss:$16 sps:$4 sm:$0xff]  }
  0x47   : > { %607 = vmatpush1.bf16.msra.mxu0 %v1257_v3  ;;  %648 = vmatpush1.bf16.msra.mxu1 %v1258_v4  ;;  %v1264_v8 = vld [vmem:[#allocation4 + $0x28] ss:$16 sps:$4 sm:$0xff]   ;;  %v1265_v9 = vld [vmem:[#allocation4 + $0x44] ss:$16 sps:$4 sm:$0xff]   ;;  %v1267_v10 = vld [vmem:[#allocation4 + $0x4c] ss:$16 sps:$4 sm:$0xff]  }
  0x48   : > { %608 = vmatprep.subr.bf16.mxu0 %v1259_v5  ;;  %649 = vmatprep.subr.bf16.mxu1 %v1261_v6  ;;  %v1269_v11 = vld [vmem:[#allocation4 + $0x40] ss:$16 sps:$4 sm:$0xff]   ;;  %v1270_v12 = vld [vmem:[#allocation4 + $0x48] ss:$16 sps:$4 sm:$0xff]   ;;  %v1271_v13 = vld [vmem:[#allocation4 + $0x64] ss:$16 sps:$4 sm:$0xff]  }
  0x49   : > { %v1273_v14 = vld [vmem:[#allocation4 + $0x6c] ss:$16 sps:$4 sm:$0xff]   ;;  %v1275_v15 = vld [vmem:[#allocation4 + $0x60] ss:$16 sps:$4 sm:$0xff]   ;;  %v1276_v16 = vld [vmem:[#allocation4 + $0x68] ss:$16 sps:$4 sm:$0xff]  }
  0x4a   : > { %v1277_v17 = vld [vmem:[#allocation4 + $0x84] ss:$16 sps:$4 sm:$0xff]   ;;  %v1279_v18 = vld [vmem:[#allocation4 + $0x8c] ss:$16 sps:$4 sm:$0xff]   ;;  %v1281_v19 = vld [vmem:[#allocation4 + $0x80] ss:$16 sps:$4 sm:$0xff]  }
  0x4b   : > { %609 = vmatpush1.bf16.msra.mxu0 %v1263_v7  ;;  %650 = vmatpush1.bf16.msra.mxu1 %v1264_v8  ;;  %v1282_v20 = vld [vmem:[#allocation4 + $0x88] ss:$16 sps:$4 sm:$0xff]   ;;  %v1283_v21 = vld [vmem:[#allocation4 + $0xa4] ss:$16 sps:$4 sm:$0xff]   ;;  %v1285_v22 = vld [vmem:[#allocation4 + $0xac] ss:$16 sps:$4 sm:$0xff]  }
  0x4c   : > { %610 = vmatprep.subr.bf16.mxu0 %v1265_v9  ;;  %651 = vmatprep.subr.bf16.mxu1 %v1267_v10  ;;  %v1287_v23 = vld [vmem:[#allocation4 + $0xa0] ss:$16 sps:$4 sm:$0xff]   ;;  %v1288_v24 = vld [vmem:[#allocation4 + $0xa8] ss:$16 sps:$4 sm:$0xff]   ;;  %v1289_v25 = vld [vmem:[#allocation4 + $0xc4] ss:$16 sps:$4 sm:$0xff]  }
  0x4d   : > { %v1291_v26 = vld [vmem:[#allocation4 + $0xcc] ss:$16 sps:$4 sm:$0xff]   ;;  %s1646_s21 = smov (!%p348_p6, %s1437_s21), 1  ;;  %v1293_v27 = vld [vmem:[#allocation4 + $0xc0] ss:$16 sps:$4 sm:$0xff]  }
  0x4e   : > { %v1294_v28 = vld [vmem:[#allocation4 + $0xc8] ss:$16 sps:$4 sm:$0xff]   ;;  %v1295_v29 = vld [vmem:[#allocation4 + $0xe4] ss:$16 sps:$4 sm:$0xff]   ;;  %v1297_v30 = vld [vmem:[#allocation4 + $0xec] ss:$16 sps:$4 sm:$0xff]  }
  0x4f   : > { %611 = vmatpush1.bf16.msra.mxu0 %v1269_v11  ;;  %652 = vmatpush1.bf16.msra.mxu1 %v1270_v12  ;;  %s1126_s26 = sshll.u32 %s1646_s21, 2  ;;  %v1299_v31 = vld [vmem:[#allocation4 + $0xe0] ss:$16 sps:$4 sm:$0xff]   ;;  %v1300_v32 = vld [vmem:[#allocation4 + $0xe8] ss:$16 sps:$4 sm:$0xff]   ;;  %s1603_s18 = sshll.u32 %s1646_s21, 3 }
  0x50   : > { %612 = vmatprep.subr.bf16.mxu0 %v1271_v13  ;;  %653 = vmatprep.subr.bf16.mxu1 %v1273_v14  ;;  %v1303_v33 = vld [vmem:[#allocation2 + $0x4] ss:$16 sps:$4 sm:$0xff]   ;;  %v1306_v34 = vld [vmem:[#allocation2 + $0xc] ss:$16 sps:$4 sm:$0xff]   ;;  %s355_s8 = scalar_lea.vmem %s1627_s1, %s1126_s26  ;;  %v1301_v35 = vld [vmem:[#allocation2] ss:$16 sps:$4 sm:$0xff]   ;;  %s351_s17 = scalar_lea.vmem %s1626_s0, %s1126_s26 }
  0x51   : > { %v1304_v36 = vld [vmem:[#allocation2 + $0x8] ss:$16 sps:$4 sm:$0xff]   ;;  %v413_v37 = vld [vmem:[%s355_s8] sm:$0xf]  ;;  %v1309_v38 = vld [vmem:[#allocation2 + $0x24] ss:$16 sps:$4 sm:$0xff]   ;;  %s362_s24 = scalar_lea.vmem %s1628_s2, %s1603_s18  ;;  %s371_s7 = scalar_lea.vmem %s1631_s5, %s1603_s18 }
  0x52   : > { %v1312_v39 = vld [vmem:[#allocation2 + $0x2c] ss:$16 sps:$4 sm:$0xff]   ;;  %v1307_v40 = vld [vmem:[#allocation2 + $0x20] ss:$16 sps:$4 sm:$0xff]   ;;  %v1310_v41 = vld [vmem:[#allocation2 + $0x28] ss:$16 sps:$4 sm:$0xff]   ;;  %s378_s11 = scalar_lea.vmem %s1632_s6, %s1603_s18 }
  0x53   : > { %613 = vmatpush1.bf16.msra.mxu0 %v1275_v15  ;;  %654 = vmatpush1.bf16.msra.mxu1 %v1276_v16  ;;  %v1315_v42 = vld [vmem:[#allocation2 + $0x44] ss:$16 sps:$4 sm:$0xff]   ;;  %v1318_v43 = vld [vmem:[#allocation2 + $0x4c] ss:$16 sps:$4 sm:$0xff]   ;;  %v1313_v44 = vld [vmem:[#allocation2 + $0x40] ss:$16 sps:$4 sm:$0xff]  }
  0x54   : > { %614 = vmatprep.subr.bf16.mxu0 %v1277_v17  ;;  %655 = vmatprep.subr.bf16.mxu1 %v1279_v18  ;;  %v1316_v45 = vld [vmem:[#allocation2 + $0x48] ss:$16 sps:$4 sm:$0xff]   ;;  %v1321_v46 = vld [vmem:[#allocation2 + $0x64] ss:$16 sps:$4 sm:$0xff]   ;;  %v1324_v47 = vld [vmem:[#allocation2 + $0x6c] ss:$16 sps:$4 sm:$0xff]  }
  0x55   : > { %v1319_v48 = vld [vmem:[#allocation2 + $0x60] ss:$16 sps:$4 sm:$0xff]   ;;  %v1322_v49 = vld [vmem:[#allocation2 + $0x68] ss:$16 sps:$4 sm:$0xff]   ;;  %v1327_v50 = vld [vmem:[#allocation2 + $0x84] ss:$16 sps:$4 sm:$0xff]  }
  0x56   : > { %v1330_v51 = vld [vmem:[#allocation2 + $0x8c] ss:$16 sps:$4 sm:$0xff]   ;;  %v1325_v52 = vld [vmem:[#allocation2 + $0x80] ss:$16 sps:$4 sm:$0xff]   ;;  %v1328_v53 = vld [vmem:[#allocation2 + $0x88] ss:$16 sps:$4 sm:$0xff]  }
  0x57   : > { %615 = vmatpush1.bf16.msra.mxu0 %v1281_v19  ;;  %656 = vmatpush1.bf16.msra.mxu1 %v1282_v20  ;;  %v1333_v54 = vld [vmem:[#allocation2 + $0xa4] ss:$16 sps:$4 sm:$0xff]   ;;  %v1336_v55 = vld [vmem:[#allocation2 + $0xac] ss:$16 sps:$4 sm:$0xff]   ;;  %v1331_v56 = vld [vmem:[#allocation2 + $0xa0] ss:$16 sps:$4 sm:$0xff]  }
  0x58   : > { %616 = vmatprep.subr.bf16.mxu0 %v1283_v21  ;;  %657 = vmatprep.subr.bf16.mxu1 %v1285_v22  ;;  %v1334_v57 = vld [vmem:[#allocation2 + $0xa8] ss:$16 sps:$4 sm:$0xff]   ;;  %v1339_v58 = vld [vmem:[#allocation2 + $0xc4] ss:$16 sps:$4 sm:$0xff]   ;;  %v1342_v59 = vld [vmem:[#allocation2 + $0xcc] ss:$16 sps:$4 sm:$0xff]  }
  0x59   : > { %v1337_v60 = vld [vmem:[#allocation2 + $0xc0] ss:$16 sps:$4 sm:$0xff]   ;;  %v1340_v61 = vld [vmem:[#allocation2 + $0xc8] ss:$16 sps:$4 sm:$0xff]   ;;  %v1345_v62 = vld [vmem:[#allocation2 + $0xe4] ss:$16 sps:$4 sm:$0xff]  }
  0x5a   : > { %v1348_v63 = vld [vmem:[#allocation2 + $0xec] ss:$16 sps:$4 sm:$0xff]   ;;  %v1346_v1 = vld [vmem:[#allocation2 + $0xe8] ss:$16 sps:$4 sm:$0xff]   ;;  %v380_v2 = vld [vmem:[%s351_s17] sm:$0xf] }
  0x5b   : > { %617 = vmatpush1.bf16.msra.mxu0 %v1287_v23  ;;  %658 = vmatpush1.bf16.msra.mxu1 %v1288_v24  ;;  %v943_v12 = vld [vmem:[%s362_s24] sm:$0xff] }
  0x5c   : > { %618 = vmatprep.subr.bf16.mxu0 %v1289_v25  ;;  %659 = vmatprep.subr.bf16.mxu1 %v1291_v26 }
  0x5f   : > { %619 = vmatpush1.bf16.msra.mxu0 %v1293_v27  ;;  %660 = vmatpush1.bf16.msra.mxu1 %v1294_v28 }
  0x60   : > { %620 = vmatprep.subr.bf16.mxu0 %v1295_v29  ;;  %661 = vmatprep.subr.bf16.mxu1 %v1297_v30 }
  0x63   : > { %621 = vmatpush1.bf16.msra.mxu0 %v1299_v31  ;;  %662 = vmatpush1.bf16.msra.mxu1 %v1300_v32 }
  0x64   : > { %848 = vmatprep.subr.bf16.mxu0 %v1303_v33  ;;  %889 = vmatprep.subr.bf16.mxu1 %v1306_v34 }
  0x66   : > { %639 = vmatmul.mubr.bf16.vlgmr.msra.gmra.mrb[0].mxu0 %v413_v37  ;;  %680 = vmatmul.mubr.bf16.vlgmr.msra.gmra.mrb[0].mxu1 %v413_v37 }
  0x67   : > { %849 = vmatpush1.bf16.msra.mxu0 %v1301_v35  ;;  %890 = vmatpush1.bf16.msra.mxu1 %v1304_v36 }
  0x68   : > { %850 = vmatprep.subr.bf16.mxu0 %v1309_v38  ;;  %891 = vmatprep.subr.bf16.mxu1 %v1312_v39 }
  0x69   : > { %880 = vmatprep.mubr.bf16.mxu0 %v1451_v0  ;;  %921 = vmatprep.mubr.bf16.mxu1 %v1451_v0  ;;  %v1343_v0 = vld [vmem:[#allocation2 + $0xe0] ss:$16 sps:$4 sm:$0xff]  }
  0x6b   : > { %851 = vmatpush1.bf16.msra.mxu0 %v1307_v40  ;;  %892 = vmatpush1.bf16.msra.mxu1 %v1310_v41 }
  0x6c   : > { %852 = vmatprep.subr.bf16.mxu0 %v1315_v42  ;;  %893 = vmatprep.subr.bf16.mxu1 %v1318_v43 }
  0x6f   : > { %853 = vmatpush1.bf16.msra.mxu0 %v1313_v44  ;;  %894 = vmatpush1.bf16.msra.mxu1 %v1316_v45 }
  0x70   : > { %854 = vmatprep.subr.bf16.mxu0 %v1321_v46  ;;  %895 = vmatprep.subr.bf16.mxu1 %v1324_v47 }
  0x73   : > { %855 = vmatpush1.bf16.msra.mxu0 %v1319_v48  ;;  %896 = vmatpush1.bf16.msra.mxu1 %v1322_v49 }
  0x74   : > { %856 = vmatprep.subr.bf16.mxu0 %v1327_v50  ;;  %897 = vmatprep.subr.bf16.mxu1 %v1330_v51 }
  0x77   : > { %857 = vmatpush1.bf16.msra.mxu0 %v1325_v52  ;;  %898 = vmatpush1.bf16.msra.mxu1 %v1328_v53 }
  0x78   : > { %858 = vmatprep.subr.bf16.mxu0 %v1333_v54  ;;  %899 = vmatprep.subr.bf16.mxu1 %v1336_v55 }
  0x7b   : > { %859 = vmatpush1.bf16.msra.mxu0 %v1331_v56  ;;  %900 = vmatpush1.bf16.msra.mxu1 %v1334_v57 }
  0x7c   : > { %860 = vmatprep.subr.bf16.mxu0 %v1339_v58  ;;  %901 = vmatprep.subr.bf16.mxu1 %v1342_v59 }
  0x7f   : > { %861 = vmatpush1.bf16.msra.mxu0 %v1337_v60  ;;  %902 = vmatpush1.bf16.msra.mxu1 %v1340_v61 }
  0x80   : > { %862 = vmatprep.subr.bf16.mxu0 %v1345_v62  ;;  %903 = vmatprep.subr.bf16.mxu1 %v1348_v63 }
  0x83   : > { %863 = vmatpush1.bf16.msra.mxu0 %v1343_v0  ;;  %904 = vmatpush1.bf16.msra.mxu1 %v1346_v1 }
  0x86   : > { %881 = vmatmul.mubr.bf16.vlgmr.msra.gmra.mrb[0].mxu0 %v380_v2  ;;  %922 = vmatmul.mubr.bf16.vlgmr.msra.gmra.mrb[0].mxu1 %v380_v2 }
 0x159   : > { %v882_v3 = vpop.f32.mrb[0].mxu0  ;;  %v923_v4 = vpop.f32.mrb[0].mxu1 }
 0x15a   : > { %v930_v5 = vmul.f32 0.5, %v882_v3  ;;  %v932_v6 = vmul.f32 0.5, %v923_v4  ;;  %v884_v7 = vpop.f32.mrb[1].mxu0  ;;  %v925_v8 = vpop.f32.mrb[1].mxu1 }
 0x15b   : > { %v931_v9 = vmul.f32 0.5, %v884_v7  ;;  %v886_v10 = vpop.f32.mrb[2].mxu0  ;;  %v927_v11 = vpop.f32.mrb[2].mxu1 }
 0x15c   : > { %1349 = vtanh.f32 %v930_v5  ;;  %v887_v13 = vpop.f32.mrb[3].mxu0  ;;  %v928_v14 = vpop.f32.mrb[3].mxu1 }
 0x15d   : > { %1351 = vtanh.f32 %v932_v6 }
 0x15e   : > { %1353 = vtanh.f32 %v931_v9 }
 0x15f   : > { %1355 = vtanh.f32 %v943_v12 }
 0x160   : > { %1357 = vtanh.f32 %v925_v8 }
 0x166   : > { %v1350_v15 = vpop.eup %1349 }
 0x167   : > { %v1352_v16 = vpop.eup %1351  ;;  %v936_v17 = vmul.f32 0.5, %v1350_v15 }
 0x168   : > { %v1354_v18 = vpop.eup %1353  ;;  %v938_v19 = vmul.f32 0.5, %v1352_v16 }
 0x169   : > { %v1356_v20 = vpop.eup %1355  ;;  %v939_v21 = vadd.f32 0.5, %v936_v17  ;;  %v937_v22 = vmul.f32 0.5, %v1354_v18 }
 0x16a   : > { %v1358_v23 = vpop.eup %1357  ;;  %v941_v24 = vadd.f32 0.5, %v938_v19 }
 0x16b   : > { %v940_v25 = vadd.f32 0.5, %v937_v22  ;;  %v945_v26 = vmul.f32 %v1358_v23, %v939_v21 }
 0x16c   : > { %v949_v27 = vmul.f32 %v1356_v20, %v941_v24 }
 0x16d   : > { %v944_v28 = vmul.f32 %v943_v12, %v940_v25 }
 0x16e   : > { %950 = vst [vmem:[%s371_s7] sm:$0xff] %v949_v27 }
 0x16f   : > { %v946_v29 = vadd.f32 %v945_v26, %v944_v28 }
 0x171   : > { %947 = vst [vmem:[%s378_s11] sm:$0xff] %v946_v29 }
 0x172 PF: > { %s19_s23 = sadd.s32 1, %s1445_s23   ;;  %s1641_s21 = smov %s1441_s22 }
 0x173   : > { %p16_p8 = scmp.ge.s32.totalorder %s19_s23, 4   ;;  %s1642_s22 = smov %s1644_s25 }
 0x175   :  { %18 = sbr.rel (!%p16_p8) target bundleno = 3 (0x3), region = 99 }
 0x17c   :  { %996 = vsyncpa [#allocation3], 1 }
 0x17d   :  { %998 = vsyncpa [#allocation3 + $0x1], 1 }
 0x17e   :  { %999 = vsyncpa [#allocation5], 1 }

</bundles_post_ra>
